<compile_context>
chip_gen: v5e
topology: v5e:2x2
jax: 0.10.0
libtpu: 0.0.40
codegen_flags: <defaults>
</compile_context>

<pallas_src>
import functools

import jax
import jax.numpy as jnp
from jax.experimental import pallas as pl
from jax.experimental.pallas import tpu as pltpu


def _round_up(x, m):
    return (x + m - 1) // m * m


def _ocl_kernel(bi_ref, bj_ref,              # scalar prefetch (index maps only)
                er_ref, ec_ref,              # (TILE, TK) row / col embedding blocks
                nr_ref, nc_ref,              # (TILE,1)/(1,TILE) f32 squared norms
                lr_ref, lc_ref,              # (TILE,1)/(1,TILE) int32 labels
                ir_ref, ic_ref,              # (TILE,1)/(1,TILE) int32 sentinel ids
                out_ref,                     # (1, TILE) lane-dense partial sums
                acc_ref=None,                # (TILE,TILE) f32 scratch (num_k>1 only)
                *, margin, num_k):
    del bi_ref, bj_ref  # consumed only by the BlockSpec index maps

    # Gram block: E_rows @ E_cols^T (contract the feature axis on the MXU).
    prod = jax.lax.dot_general(
        er_ref[...], ec_ref[...],
        dimension_numbers=(((1,), (1,)), ((), ())),
        preferred_element_type=jnp.float32)

    if num_k > 1:
        # program_id stays at the top level of the body (never inside pl.when).
        k = pl.program_id(1)

        @pl.when(k == 0)
        def _():                       # init fused into first K step: no memset
            acc_ref[...] = prod

        @pl.when(k != 0)
        def _():
            acc_ref[...] += prod

    def _epilogue():
        gram = prod if num_k == 1 else acc_ref[...]
        # ||e_i - e_j||^2 = |e_i|^2 + |e_j|^2 - 2 e_i.e_j  (clamped at 0)
        d2 = jnp.maximum(nr_ref[...] + nc_ref[...] - 2.0 * gram, 0.0)
        dist = jnp.sqrt(d2)
        hinge = jnp.maximum(margin - dist, 0.0)
        same = lr_ref[...] == lc_ref[...]
        per_pair = jnp.where(same, d2, hinge * hinge)
        # Strict upper triangle AND batch padding in ONE compare: padded rows
        # carry +BIG sentinel ids, padded columns carry -BIG sentinel ids.
        valid = ir_ref[...] < ic_ref[...]
        masked = jnp.where(valid, per_pair, 0.0)
        # Lane-dense (1, TILE) partial sums -> distinct output block per tile.
        out_ref[...] = jnp.sum(masked, axis=0, keepdims=True)

    if num_k == 1:
        _epilogue()
    else:
        pl.when(k == num_k - 1)(_epilogue)


def online_contrastive_loss(embeddings, labels, margin, *, tile=None,
                            mxu_dtype=jnp.bfloat16):
    """embeddings: (N, D) float, labels: (N,) int. Returns scalar f32 loss."""
    n, d = embeddings.shape
    if n < 2:                       # no pairs -> avoid divide-by-zero
        return jnp.zeros((), dtype=jnp.float32)

    emb = embeddings.astype(jnp.float32)

    # ---- feature (contraction) axis tiling ----------------------------------
    if d <= 1024:
        d_pad, tk = d, d
    else:
        d_pad = _round_up(d, 128)
        tk = 128
        for cand in (1024, 512, 256):
            if d_pad % cand == 0:
                tk = cand
                break
    num_k = d_pad // tk

    # ---- pair-plane tiling ---------------------------------------------------
    if tile is None:
        tile = 512 if n > 512 else _round_up(n, 8)
    n_pad = _round_up(n, tile)
    if not (tile % 128 == 0 or tile == n_pad):
        raise ValueError("tile must be a multiple of 128 or cover the padded batch")
    num_blocks = n_pad // tile

    # ---- pad inputs (padded pairs are masked by the sentinel ids) ------------
    if (n_pad, d_pad) != (n, d):
        emb = jnp.pad(emb, ((0, n_pad - n), (0, d_pad - d)))
    lab = labels.astype(jnp.int32)
    if n_pad != n:
        lab = jnp.pad(lab, (0, n_pad - n))

    # f32 squared norms computed once; both orientations fed (no in-kernel
    # transposes).  Only the MXU operands are down-cast.
    norms = jnp.sum(emb * emb, axis=1)
    emb_mxu = emb.astype(mxu_dtype)
    norms_r = norms.reshape(n_pad, 1)
    norms_c = norms.reshape(1, n_pad)
    lab_r = lab.reshape(n_pad, 1)
    lab_c = lab.reshape(1, n_pad)

    # Sentinel ids: (row_id < col_id) == strict upper triangle & not padding.
    idx = jnp.arange(n_pad, dtype=jnp.int32)
    big = jnp.int32(1 << 30)
    ids_r = jnp.where(idx < n, idx, big).reshape(n_pad, 1)
    ids_c = jnp.where(idx < n, idx, -big).reshape(1, n_pad)

    # Upper-triangle tile enumeration (bi <= bj), fed via scalar prefetch.
    # bi-major order keeps consecutive tiles on the same row strip.
    tri = [(i, j) for i in range(num_blocks) for j in range(i, num_blocks)]
    num_tiles = len(tri)
    bi_arr = jnp.asarray([p[0] for p in tri], dtype=jnp.int32)
    bj_arr = jnp.asarray([p[1] for p in tri], dtype=jnp.int32)

    kernel = functools.partial(_ocl_kernel, margin=float(margin),
                               num_k=int(num_k))

    itemsize = jnp.dtype(mxu_dtype).itemsize
    # Triple-buffer the embedding streams once blocks are DMA-latency sized.
    deep_pipeline = tile * tk * itemsize >= (1 << 20)

    def _emb_spec(index_map):
        if deep_pipeline:
            return pl.BlockSpec((tile, tk), index_map,
                                pipeline_mode=pl.Buffered(3))
        return pl.BlockSpec((tile, tk), index_map)

    in_specs = [
        _emb_spec(lambda t, k, bi, bj: (bi[t], k)),                 # row emb
        _emb_spec(lambda t, k, bi, bj: (bj[t], k)),                 # col emb
        pl.BlockSpec((tile, 1), lambda t, k, bi, bj: (bi[t], 0)),   # row norms
        pl.BlockSpec((1, tile), lambda t, k, bi, bj: (0, bj[t])),   # col norms
        pl.BlockSpec((tile, 1), lambda t, k, bi, bj: (bi[t], 0)),   # row labels
        pl.BlockSpec((1, tile), lambda t, k, bi, bj: (0, bj[t])),   # col labels
        pl.BlockSpec((tile, 1), lambda t, k, bi, bj: (bi[t], 0)),   # row ids
        pl.BlockSpec((1, tile), lambda t, k, bi, bj: (0, bj[t])),   # col ids
    ]

    grid_spec = pltpu.PrefetchScalarGridSpec(
        num_scalar_prefetch=2,
        grid=(num_tiles, num_k),
        in_specs=in_specs,
        out_specs=pl.BlockSpec((1, tile), lambda t, k, bi, bj: (t, 0)),
        scratch_shapes=([pltpu.VMEM((tile, tile), jnp.float32)]
                        if num_k > 1 else []),
    )

    # Raise the scoped-VMEM limit only when the working set actually needs it.
    bufs = 3 if deep_pipeline else 2
    est_vmem = (2 * bufs * tile * tk * itemsize
                + (tile * tile * 4 if num_k > 1 else 0)
                + 4 * tile * tile * 4)
    vmem_limit = 32 * 1024 * 1024 if est_vmem > 12 * 1024 * 1024 else None

    flops = 2 * num_tiles * tile * tile * d_pad
    bytes_accessed = (2 * num_tiles * tile * d_pad * itemsize
                      + num_tiles * tile * 4 + 6 * n_pad * 4)

    partials = pl.pallas_call(
        kernel,
        out_shape=jax.ShapeDtypeStruct((num_tiles, tile), jnp.float32),
        grid_spec=grid_spec,
        compiler_params=pltpu.CompilerParams(
            dimension_semantics=("parallel", "arbitrary"),
            vmem_limit_bytes=vmem_limit),
        cost_estimate=pl.CostEstimate(
            flops=flops,
            transcendentals=num_tiles * tile * tile,
            bytes_accessed=bytes_accessed),
    )(bi_arr, bj_arr, emb_mxu, emb_mxu, norms_r, norms_c, lab_r, lab_c,
      ids_r, ids_c)

    n_pairs = n * (n - 1) / 2.0
    return jnp.sum(partials) / n_pairs


def _reference_loss(embeddings, labels, margin):
    # Pure-JAX reference replicating the PyTorch forward exactly.
    n = embeddings.shape[0]
    diff = embeddings[:, None, :] - embeddings[None, :, :]
    d2 = jnp.sum(diff * diff, axis=-1)
    same = labels[:, None] == labels[None, :]
    neg = jnp.maximum(margin - jnp.sqrt(jnp.maximum(d2, 0.0)), 0.0) ** 2
    per_pair = jnp.where(same, d2, neg)
    row = jnp.arange(n)[:, None]
    col = jnp.arange(n)[None, :]
    tri = (row < col).astype(jnp.float32)
    return jnp.sum(per_pair * tri) / (n * (n - 1) / 2.0)


if __name__ == "__main__":
    key = jax.random.PRNGKey(0)
    k1, k2, k3, k4, k5, k6 = jax.random.split(key, 6)
    margin = 1.0

    # Case 1: small batch, single triangle tile, single K step (bf16 MXU path).
    emb1 = jax.random.normal(k1, (8, 32), dtype=jnp.float32)
    lab1 = jax.random.randint(k2, (8,), 0, 3, dtype=jnp.int32)
    out1 = jax.block_until_ready(online_contrastive_loss(emb1, lab1, margin))
    ref1 = _reference_loss(emb1, lab1, margin)
    assert jnp.allclose(out1, ref1, rtol=1e-2, atol=1e-2), (out1, ref1)

    # Case 1b: f32 MXU fallback path, tight tolerance vs. the reference.
    out1f = jax.block_until_ready(
        online_contrastive_loss(emb1, lab1, margin, mxu_dtype=jnp.float32))
    assert jnp.allclose(out1f, ref1, rtol=1e-4, atol=1e-5), (out1f, ref1)

    # Case 2: batch padding + scalar-prefetched triangle-tile enumeration
    # (3 tiles) + sentinel-id validity mask.
    emb2 = jax.random.normal(k3, (200, 64), dtype=jnp.float32)
    lab2 = jax.random.randint(k4, (200,), 0, 5, dtype=jnp.int32)
    out2 = jax.block_until_ready(
        online_contrastive_loss(emb2, lab2, margin, tile=128))
    ref2 = _reference_loss(emb2, lab2, margin)
    assert jnp.allclose(out2, ref2, rtol=1e-2, atol=1e-2), (out2, ref2)

    # Case 3: D > 1024 exercises the K-axis accumulator (num_k > 1) path.
    emb3 = jax.random.normal(k5, (16, 1536), dtype=jnp.float32)
    lab3 = jax.random.randint(k6, (16,), 0, 3, dtype=jnp.int32)
    out3 = jax.block_until_ready(online_contrastive_loss(emb3, lab3, margin))
    ref3 = _reference_loss(emb3, lab3, margin)
    assert jnp.allclose(out3, ref3, rtol=1e-2, atol=1e-2), (out3, ref3)

    print("KERNEL_OK")
</pallas_src>

<mosaic_0001>
module attributes {stable_mosaic.version = 11 : i64} {
  func.func @_ocl_kernel(%arg0: i32, %arg1: i32, %arg2: memref<1xi32, #tpu.memory_space<smem>>, %arg3: memref<1xi32, #tpu.memory_space<smem>>, %arg4: memref<8x32xbf16, #tpu.memory_space<vmem>>, %arg5: memref<8x32xbf16, #tpu.memory_space<vmem>>, %arg6: memref<8x1xf32, #tpu.memory_space<vmem>>, %arg7: memref<1x8xf32, #tpu.memory_space<vmem>>, %arg8: memref<8x1xi32, #tpu.memory_space<vmem>>, %arg9: memref<1x8xi32, #tpu.memory_space<vmem>>, %arg10: memref<8x1xi32, #tpu.memory_space<vmem>>, %arg11: memref<1x8xi32, #tpu.memory_space<vmem>>, %arg12: memref<1x8xf32, #tpu.memory_space<vmem>>) attributes {dimension_semantics = [#tpu.dimension_semantics<parallel>, #tpu.dimension_semantics<arbitrary>], iteration_bounds = array<i64: 1, 1>, scalar_prefetch = 2 : i64, scratch_operands = 0 : i64, tpu.core_type = #tpu.core_type<tc>, window_params = [{transform_indices = @transform_0, window_bounds = array<i64: 8, 32>}, {transform_indices = @transform_1, window_bounds = array<i64: 8, 32>}, {transform_indices = @transform_2, window_bounds = array<i64: 8, 1>}, {transform_indices = @transform_3, window_bounds = array<i64: 1, 8>}, {transform_indices = @transform_4, window_bounds = array<i64: 8, 1>}, {transform_indices = @transform_5, window_bounds = array<i64: 1, 8>}, {transform_indices = @transform_6, window_bounds = array<i64: 8, 1>}, {transform_indices = @transform_7, window_bounds = array<i64: 1, 8>}, {transform_indices = @transform_8, window_bounds = array<i64: 1, 8>}]} {
    %c0 = arith.constant 0 : index
    %c0_0 = arith.constant 0 : index
    %0 = vector.load %arg4[%c0, %c0_0] : memref<8x32xbf16, #tpu.memory_space<vmem>>, vector<8x32xbf16>
    %c0_1 = arith.constant 0 : index
    %c0_2 = arith.constant 0 : index
    %1 = vector.load %arg5[%c0_1, %c0_2] : memref<8x32xbf16, #tpu.memory_space<vmem>>, vector<8x32xbf16>
    %cst = arith.constant dense<0.000000e+00> : vector<8x8xf32>
    %2 = tpu.matmul %0, %1, %cst {dimension_numbers = #tpu.dot_dimension_numbers<[1], [1], [0], [0], [0, 0, 1, 0], [], []>} : vector<8x32xbf16>, vector<8x32xbf16>, vector<8x8xf32> -> vector<8x8xf32>
    %c0_3 = arith.constant 0 : index
    %c0_4 = arith.constant 0 : index
    %3 = vector.load %arg6[%c0_3, %c0_4] : memref<8x1xf32, #tpu.memory_space<vmem>>, vector<8x1xf32>
    %c0_5 = arith.constant 0 : index
    %c0_6 = arith.constant 0 : index
    %4 = vector.load %arg7[%c0_5, %c0_6] : memref<1x8xf32, #tpu.memory_space<vmem>>, vector<1x8xf32>
    %5 = vector.broadcast %3 : vector<8x1xf32> to vector<8x8xf32>
    %6 = vector.broadcast %4 : vector<1x8xf32> to vector<8x8xf32>
    %7 = arith.addf %5, %6 : vector<8x8xf32>
    %cst_7 = arith.constant 2.000000e+00 : f32
    %8 = vector.broadcast %cst_7 : f32 to vector<8x8xf32>
    %9 = arith.mulf %8, %2 : vector<8x8xf32>
    %10 = arith.subf %7, %9 : vector<8x8xf32>
    %cst_8 = arith.constant 0.000000e+00 : f32
    %11 = vector.broadcast %cst_8 : f32 to vector<8x8xf32>
    %12 = arith.maximumf %10, %11 : vector<8x8xf32>
    %13 = math.sqrt %12 : vector<8x8xf32>
    %cst_9 = arith.constant 1.000000e+00 : f32
    %14 = vector.broadcast %cst_9 : f32 to vector<8x8xf32>
    %15 = arith.subf %14, %13 : vector<8x8xf32>
    %cst_10 = arith.constant 0.000000e+00 : f32
    %16 = vector.broadcast %cst_10 : f32 to vector<8x8xf32>
    %17 = arith.maximumf %15, %16 : vector<8x8xf32>
    %c0_11 = arith.constant 0 : index
    %c0_12 = arith.constant 0 : index
    %18 = vector.load %arg8[%c0_11, %c0_12] : memref<8x1xi32, #tpu.memory_space<vmem>>, vector<8x1xi32>
    %c0_13 = arith.constant 0 : index
    %c0_14 = arith.constant 0 : index
    %19 = vector.load %arg9[%c0_13, %c0_14] : memref<1x8xi32, #tpu.memory_space<vmem>>, vector<1x8xi32>
    %20 = vector.broadcast %18 : vector<8x1xi32> to vector<8x8xi32>
    %21 = vector.broadcast %19 : vector<1x8xi32> to vector<8x8xi32>
    %22 = arith.cmpi eq, %20, %21 : vector<8x8xi32>
    %23 = arith.mulf %17, %17 : vector<8x8xf32>
    %24 = arith.select %22, %12, %23 : vector<8x8xi1>, vector<8x8xf32>
    %c0_15 = arith.constant 0 : index
    %c0_16 = arith.constant 0 : index
    %25 = vector.load %arg10[%c0_15, %c0_16] : memref<8x1xi32, #tpu.memory_space<vmem>>, vector<8x1xi32>
    %c0_17 = arith.constant 0 : index
    %c0_18 = arith.constant 0 : index
    %26 = vector.load %arg11[%c0_17, %c0_18] : memref<1x8xi32, #tpu.memory_space<vmem>>, vector<1x8xi32>
    %27 = vector.broadcast %25 : vector<8x1xi32> to vector<8x8xi32>
    %28 = vector.broadcast %26 : vector<1x8xi32> to vector<8x8xi32>
    %29 = arith.cmpi slt, %27, %28 : vector<8x8xi32>
    %cst_19 = arith.constant 0.000000e+00 : f32
    %30 = vector.broadcast %cst_19 : f32 to vector<8x8xf32>
    %31 = arith.select %29, %24, %30 : vector<8x8xi1>, vector<8x8xf32>
    %cst_20 = arith.constant dense<0.000000e+00> : vector<8xf32>
    %32 = vector.multi_reduction <add>, %31, %cst_20 [0] : vector<8x8xf32> to vector<8xf32>
    %33 = vector.shape_cast %32 : vector<8xf32> to vector<1x8xf32>
    %c0_21 = arith.constant 0 : index
    %c0_22 = arith.constant 0 : index
    %34 = vector.load %arg12[%c0_21, %c0_22] : memref<1x8xf32, #tpu.memory_space<vmem>>, vector<1x8xf32>
    tpu.vector_store %arg12[%c0_21, %c0_22], %33 {strides = array<i32>} : memref<1x8xf32, #tpu.memory_space<vmem>>, vector<1x8xf32>,
    return
  }
  func.func @transform_0(%arg0: i32, %arg1: i32, %arg2: memref<1xi32, #tpu.memory_space<smem>>, %arg3: memref<1xi32, #tpu.memory_space<smem>>) -> (i32, i32) {
    %0 = arith.index_cast %arg0 : i32 to index
    %1 = memref.load %arg2[%0] : memref<1xi32, #tpu.memory_space<smem>>
    %c0_i32 = arith.constant 0 : i32
    return %1, %arg1 : i32, i32
  }
  func.func @transform_1(%arg0: i32, %arg1: i32, %arg2: memref<1xi32, #tpu.memory_space<smem>>, %arg3: memref<1xi32, #tpu.memory_space<smem>>) -> (i32, i32) {
    %0 = arith.index_cast %arg0 : i32 to index
    %1 = memref.load %arg3[%0] : memref<1xi32, #tpu.memory_space<smem>>
    %c0_i32 = arith.constant 0 : i32
    return %1, %arg1 : i32, i32
  }
  func.func @transform_2(%arg0: i32, %arg1: i32, %arg2: memref<1xi32, #tpu.memory_space<smem>>, %arg3: memref<1xi32, #tpu.memory_space<smem>>) -> (i32, i32) {
    %0 = arith.index_cast %arg0 : i32 to index
    %1 = memref.load %arg2[%0] : memref<1xi32, #tpu.memory_space<smem>>
    %c0_i32 = arith.constant 0 : i32
    %c0_i32_0 = arith.constant 0 : i32
    return %1, %c0_i32 : i32, i32
  }
  func.func @transform_3(%arg0: i32, %arg1: i32, %arg2: memref<1xi32, #tpu.memory_space<smem>>, %arg3: memref<1xi32, #tpu.memory_space<smem>>) -> (i32, i32) {
    %0 = arith.index_cast %arg0 : i32 to index
    %1 = memref.load %arg3[%0] : memref<1xi32, #tpu.memory_space<smem>>
    %c0_i32 = arith.constant 0 : i32
    %c0_i32_0 = arith.constant 0 : i32
    return %c0_i32, %1 : i32, i32
  }
  func.func @transform_4(%arg0: i32, %arg1: i32, %arg2: memref<1xi32, #tpu.memory_space<smem>>, %arg3: memref<1xi32, #tpu.memory_space<smem>>) -> (i32, i32) {
    %0 = arith.index_cast %arg0 : i32 to index
    %1 = memref.load %arg2[%0] : memref<1xi32, #tpu.memory_space<smem>>
    %c0_i32 = arith.constant 0 : i32
    %c0_i32_0 = arith.constant 0 : i32
    return %1, %c0_i32 : i32, i32
  }
  func.func @transform_5(%arg0: i32, %arg1: i32, %arg2: memref<1xi32, #tpu.memory_space<smem>>, %arg3: memref<1xi32, #tpu.memory_space<smem>>) -> (i32, i32) {
    %0 = arith.index_cast %arg0 : i32 to index
    %1 = memref.load %arg3[%0] : memref<1xi32, #tpu.memory_space<smem>>
    %c0_i32 = arith.constant 0 : i32
    %c0_i32_0 = arith.constant 0 : i32
    return %c0_i32, %1 : i32, i32
  }
  func.func @transform_6(%arg0: i32, %arg1: i32, %arg2: memref<1xi32, #tpu.memory_space<smem>>, %arg3: memref<1xi32, #tpu.memory_space<smem>>) -> (i32, i32) {
    %0 = arith.index_cast %arg0 : i32 to index
    %1 = memref.load %arg2[%0] : memref<1xi32, #tpu.memory_space<smem>>
    %c0_i32 = arith.constant 0 : i32
    %c0_i32_0 = arith.constant 0 : i32
    return %1, %c0_i32 : i32, i32
  }
  func.func @transform_7(%arg0: i32, %arg1: i32, %arg2: memref<1xi32, #tpu.memory_space<smem>>, %arg3: memref<1xi32, #tpu.memory_space<smem>>) -> (i32, i32) {
    %0 = arith.index_cast %arg0 : i32 to index
    %1 = memref.load %arg3[%0] : memref<1xi32, #tpu.memory_space<smem>>
    %c0_i32 = arith.constant 0 : i32
    %c0_i32_0 = arith.constant 0 : i32
    return %c0_i32, %1 : i32, i32
  }
  func.func @transform_8(%arg0: i32, %arg1: i32, %arg2: memref<1xi32, #tpu.memory_space<smem>>, %arg3: memref<1xi32, #tpu.memory_space<smem>>) -> (i32, i32) {
    %c0_i32 = arith.constant 0 : i32
    %c0_i32_0 = arith.constant 0 : i32
    return %arg0, %c0_i32 : i32, i32
  }
}

</mosaic_0001>

<bundles_post_ra>
// kernel: tpu_custom_call.1
= control target key start
LH: loop header
LB: loop body
LE: loop exit
PB: predicated region body
PF: predicated region fallthrough
CT: control target
= control target key end

     0   :  { %s444_s0 = inlined_call_operand.<no memory space> [shape: s32[1], index: 0, kind: input, shape index: {}]   ;;  %s445_s1 = inlined_call_operand.<no memory space> [shape: s32[1], index: 1, kind: input, shape index: {}]   ;;  %s446_s2 = inlined_call_operand.vmem [shape: bf16[8,32], index: 2, kind: input, shape index: {}]   ;;  %s447_s3 = inlined_call_operand.vmem [shape: bf16[8,32], index: 3, kind: input, shape index: {}]   ;;  %s448_s4 = inlined_call_operand.vmem [shape: f32[8,1], index: 4, kind: input, shape index: {}]   ;;  %s449_s5 = inlined_call_operand.vmem [shape: f32[1,8], index: 5, kind: input, shape index: {}]   ;;  %s450_s6 = inlined_call_operand.vmem [shape: s32[8,1], index: 6, kind: input, shape index: {}]   ;;  %s451_s7 = inlined_call_operand.vmem [shape: s32[1,8], index: 7, kind: input, shape index: {}]   ;;  %s452_s8 = inlined_call_operand.vmem [shape: s32[8,1], index: 8, kind: input, shape index: {}]   ;;  %s453_s9 = inlined_call_operand.vmem [shape: s32[1,8], index: 9, kind: input, shape index: {}]   ;;  %s454_s10 = inlined_call_operand.hbm [shape: f32[1,8], index: 10, kind: output, shape index: {}]  }
   0x1   :  { %p123_p0 = scmp.lt.s32.totalorder %s445_s1, 0  ;;  %p117_p1 = scmp.lt.s32.totalorder %s444_s0, 0 }
   0x2   :  { %17 = vsyncpa [#allocation6], 0  ;;  %v335_v0 = vmov 0   ;;  %vm164_vm0 = vcmask 261120   ;;  %vm229_vm5 = vcmask 64512   ;;  %vm237_vm6 = vcmask 57344  }
   0x3   :  { %302 = vset.pattern.permute.xlu0 %v335_v0  ;;  %303 = vset.pattern.permute.xlu1 %v335_v0  ;;  %s456_s1 = smov (!%p123_p0, %s445_s1), 0  ;;  %s458_s0 = smov (!%p117_p1, %s444_s0), 0 }
   0x4   :  { %s295_s21 = sshll.u32 %s456_s1, 2  ;;  %s137_s24 = scalar_lea.vmem %s449_s5, %s456_s1 }
   0x5   :  { %s126_s27 = scalar_lea.vmem %s447_s3, %s295_s21  ;;  %s294_s28 = sshll.u32 %s458_s0, 2  ;;  %v304_v7 = vld [vmem:[%s137_s24] ss:$0 sm:$0xff] }
   0x6   :  { %v163_v1 = vld [vmem:[%s126_s27] sm:$0xf]  ;;  %s296_s29 = sshll.u32 %s458_s0, 3  ;;  %s148_s3 = scalar_lea.vmem %s451_s7, %s456_s1 }
   0x7   :  { %v169_v2 = vsel %vm164_vm0, %v163_v1, 0  ;;  %s132_s12 = scalar_lea.vmem %s448_s4, %s296_s29  ;;  %s154_s5 = scalar_lea.vmem %s452_s8, %s296_s29  ;;  %v305_v27 = vld [vmem:[%s148_s3] ss:$0 sm:$0xff] }
   0x8   :  { %178 = vmatpush.bf16.xpose.msra.mxu0 %v169_v2  ;;  %v184_v3 = vld [vmem:[%s132_s12] sm:$0xff]  ;;  %s120_s0 = scalar_lea.vmem %s446_s2, %s294_s28  ;;  %s143_s4 = scalar_lea.vmem %s450_s6, %s296_s29 }
   0x9   :  { %188 = vperm.xlu0 %302, %v184_v3   ;;  %v221_v4 = vld [vmem:[%s154_s5] sm:$0xff]  ;;  %s159_s22 = scalar_lea.vmem %s453_s9, %s456_s1  ;;  %s336_s9 = smov [#allocation5]  }
   0xa   :  { %224 = vperm.xlu1 %303, %v221_v4   ;;  %v162_v5 = vld [vmem:[%s120_s0] sm:$0xf]  ;;  %s244_s23 = sshll.u32 %s336_s9, 4  ;;  %s246_s1 = sshll.u32 %s454_s10, 4  ;;  %s245_s23 = int_to_ptr.vmem [resolvable:$true] %s244_s23  ;;  %s247_s1 = int_to_ptr.hbm [resolvable:$true] %s246_s1 }
   0xb   :  { %v212_v6 = vld [vmem:[%s143_s4] sm:$0xff] }
   0xc   :  { %v306_v25 = vld [vmem:[%s159_s22] ss:$0 sm:$0xff] }
   0xf   :  { %299 = vmatmul.msk.bf16.vlgmr.msra.gmra.mxu0 %vm164_vm0, %v162_v5 }
  0x11   :  { %215 = vperm.xlu0 %302, %v212_v6  }
  0x7b   :  { %v189_v8 = vpop.permute.xlu0 %188 }
  0x7c   :  { %v194_v9 = vadd.f32 %v304_v7, %v189_v8  ;;  %v225_v28 = vpop.permute.xlu1 %224 }
  0x7d   :  { %vm227_vm3 = vcmp.lt.s32.totalorder %v225_v28, %v306_v25 }
  0x83   :  { %v216_v29 = vpop.permute.xlu0 %215 }
  0x84   :  { %vm218_vm4 = vcmp.eq.s32.totalorder %v216_v29, %v305_v27 }
  0x8c   :  { %v180_v10 = vpop.f32.mrf.mxu0 }
  0x8d   :  { %v195_v11 = vmul.f32 2.0, %v180_v10 }
  0x8f   :  { %v196_v12 = vsub.f32 %v194_v9, %v195_v11 }
  0x91   :  { %v197_v13 = vmax.f32 %v196_v12, 0.0 }
  0x93   :  { %307 = vrsqrt.f32 %v197_v13  ;;  %vm205_vm1 = vcmp.eq.f32.partialorder %v197_v13, inf  ;;  %v208_v22 = vand.u32 2147483648, %v197_v13  ;;  %vm207_vm2 = vcmp.eq.f32.partialorder %v197_v13, 0.0 }
  0x94   :  { %v182_v14 = vpop.f32.mrf.mxu0 }
  0x99   :  { %v308_v15 = vpop.eup %307 }
  0x9a   :  { %v199_v16 = vmul.f32 %v308_v15, %v197_v13 }
  0x9c   :  { %v200_v17 = vmul.f32 %v308_v15, %v199_v16 }
  0x9e   :  { %v201_v18 = vmul.f32 0.5, %v200_v17 }
  0xa0   :  { %v202_v19 = vsub.f32 1.5, %v201_v18 }
  0xa2   :  { %v203_v20 = vmul.f32 %v308_v15, %v202_v19 }
  0xa4   :  { %v204_v21 = vmul.f32 %v203_v20, %v197_v13 }
  0xa6   :  { %v206_v23 = vsel %vm205_vm1, %v197_v13, %v204_v21 }
  0xa7   :  { %v209_v24 = vsel %vm207_vm2, %v208_v22, %v206_v23 }
  0xa8   :  { %v210_v26 = vsub.f32 1.0, %v209_v24 }
  0xaa   :  { %v211_v30 = vmax.f32 %v210_v26, 0.0 }
  0xac   :  { %v219_v31 = vmul.f32 %v211_v30, %v211_v30 }
  0xae   :  { %v220_v32 = vsel %vm218_vm4, %v197_v13, %v219_v31 }
  0xaf   :  { %v228_v33 = vsel %vm227_vm3, %v220_v32, 0.0 }
  0xb0   :  { %v230_v34 = vsel %vm229_vm5, %v228_v33, 0.0 }
  0xb1   :  { %v231_v35 = vrot.slane %v230_v34, 4 }
  0xb3   :  { %v232_v36 = vadd.f32 %v231_v35, %v230_v34 }
  0xb5   :  { %v233_v37 = vrot.slane %v232_v36, 2 }
  0xb7   :  { %v234_v38 = vadd.f32 %v233_v37, %v232_v36 }
  0xb9   :  { %v235_v39 = vrot.slane %v234_v38, 1 }
  0xbb   :  { %v236_v40 = vadd.f32 %v235_v39, %v234_v38 }
  0xbd   :  { %238 = vst.msk [vmem:[#allocation5] sm:$0x1] %vm237_vm6, %v236_v40 }
  0xbe   :  { %249 = dma.vmem_to_hbm [thread:$0]  %s245_s23, 16, %s247_s1, [#allocation6]  }
  0xbf   :  { %333 = dma.done.wait [#allocation6], 16  }
  0xc0   :  { %334 = vsyncadd [#allocation6], 4294967280 }
  0xc1   :  { %254 = vsyncpa [#allocation6], 1 }

</bundles_post_ra>
